<compile_context>
chip_gen: v7x
topology: tpu7x:2x2x1
jax: 0.10.0
libtpu: 0.0.40
codegen_flags: <defaults>
</compile_context>

<pallas_src>
import functools

import numpy as np
import jax
import jax.numpy as jnp
from jax import lax
from jax.experimental import pallas as pl
from jax.experimental.pallas import tpu as pltpu


_VMEM_LIMIT = 40 * 1024 * 1024      # explicit scoped-VMEM cap (safe on v7x's 64 MiB)
_BLOCK_TARGET = 2 * 1024 * 1024     # ~2 MiB of real data per input per grid step


def _round_up(v, m):
    return -(-v // m) * m


# ---------------------------------------------------------------------------
# Small-batch (B <= 4) path: VPU pairwise Gram on a sublane-dense layout.
# Input is reshaped to (B, S, L); blocks are (B, r, L) with r % 8 == 0 and
# L % 128 == 0.  The output is an output-resident accumulator holding per-lane
# partial sums for each of the P = B*(B+1)/2 row pairs.
# ---------------------------------------------------------------------------
def _gram_pairs_kernel(x_ref, acc_ref, *, pairs):
    @pl.when(pl.program_id(1) == 0)
    def _():
        acc_ref[...] = jnp.zeros_like(acc_ref)

    nrows = x_ref.shape[0]
    # Cast per-row (no-op for f32; needed for bf16 -> f32 accumulation).
    rows = [x_ref[a].astype(jnp.float32) for a in range(nrows)]   # (r, lanes)
    for p, (a, b) in enumerate(pairs):
        acc_ref[0, p] = acc_ref[0, p] + rows[a] * rows[b]


def _gram_small_b(x):
    b, d = x.shape
    itemsize = x.dtype.itemsize
    lanes = 512 if d >= 8 * 512 else 128
    s = -(-d // lanes)                                  # rows of width `lanes`
    r = (_BLOCK_TARGET // (b * lanes * itemsize)) // 8 * 8
    r = max(8, min(512, r))
    r = min(r, _round_up(s, 8))
    nblk = -(-s // r)
    c = 2 if nblk >= 2 else 1                           # TensorCore split (v7x)
    nblk = _round_up(nblk, c)
    steps = nblk // c
    d_pad = nblk * r * lanes
    if d_pad != d:
        x = jnp.pad(x, ((0, 0), (0, d_pad - d)))        # zero pad: Gram/norm safe
    xs = x.reshape(b, nblk * r, lanes)

    pairs = [(a, bb) for a in range(b) for bb in range(a, b)]
    p = len(pairs)

    out = pl.pallas_call(
        functools.partial(_gram_pairs_kernel, pairs=pairs),
        out_shape=jax.ShapeDtypeStruct((c, p, r, lanes), jnp.float32),
        grid_spec=pltpu.PrefetchScalarGridSpec(
            num_scalar_prefetch=0,
            grid=(c, steps),
            in_specs=[pl.BlockSpec((b, r, lanes),
                                   lambda ci, ki: (0, ci * steps + ki, 0))],
            out_specs=pl.BlockSpec((1, p, r, lanes),
                                   lambda ci, ki: (ci, 0, 0, 0)),
        ),
        compiler_params=pltpu.CompilerParams(
            dimension_semantics=("parallel", "arbitrary"),
            vmem_limit_bytes=_VMEM_LIMIT),
        cost_estimate=pl.CostEstimate(
            flops=int(2 * p * d_pad), transcendentals=0,
            bytes_accessed=int(b * d_pad * itemsize + c * p * r * lanes * 4)),
    )(xs)

    pair_sums = jnp.sum(out, axis=(0, 2, 3))            # (P,)
    scatter = np.zeros((p, b, b), np.float32)
    for pi, (a, bb) in enumerate(pairs):
        scatter[pi, a, bb] = 1.0
        scatter[pi, bb, a] = 1.0
    return jnp.einsum("p,pij->ij", pair_sums, jnp.asarray(scatter))  # (B, B)


# ---------------------------------------------------------------------------
# General-batch (B >= 5) path: MXU Gram accumulation over (B, t) blocks.
# ---------------------------------------------------------------------------
def _gram_dot_kernel(x_ref, g_ref):
    @pl.when(pl.program_id(1) == 0)
    def _():
        g_ref[...] = jnp.zeros_like(g_ref)
    x = x_ref[...]                                      # bf16 fed directly to MXU
    g_ref[0] = g_ref[0] + lax.dot_general(
        x, x, (((1,), (1,)), ((), ())),
        preferred_element_type=jnp.float32)


def _gram_dot(x):
    b, d = x.shape
    itemsize = x.dtype.itemsize
    bp = _round_up(b, 8)                                # sublane-padded rows in VMEM
    t_target = (_BLOCK_TARGET // (b * itemsize)) // 128 * 128
    t_cap = ((4 * 1024 * 1024) // (bp * itemsize)) // 128 * 128
    t = max(128, min(t_target, t_cap))
    t = min(t, _round_up(d, 128))
    nblk = -(-d // t)
    c = 2 if nblk >= 2 else 1
    nblk = _round_up(nblk, c)
    steps = nblk // c
    d_pad = nblk * t
    if d_pad != d:
        x = jnp.pad(x, ((0, 0), (0, d_pad - d)))

    out = pl.pallas_call(
        _gram_dot_kernel,
        out_shape=jax.ShapeDtypeStruct((c, b, b), jnp.float32),
        grid_spec=pltpu.PrefetchScalarGridSpec(
            num_scalar_prefetch=0,
            grid=(c, steps),
            in_specs=[pl.BlockSpec((b, t),
                                   lambda ci, ki: (0, ci * steps + ki))],
            out_specs=pl.BlockSpec((1, b, b), lambda ci, ki: (ci, 0, 0)),
        ),
        compiler_params=pltpu.CompilerParams(
            dimension_semantics=("parallel", "arbitrary"),
            vmem_limit_bytes=_VMEM_LIMIT),
        cost_estimate=pl.CostEstimate(
            flops=int(2 * b * b * d_pad), transcendentals=0,
            bytes_accessed=int(b * d_pad * itemsize + c * b * b * 4)),
    )(x)
    return jnp.sum(out, axis=0)                         # (B, B)


# ---------------------------------------------------------------------------
# Dispatch + tiny XLA epilogue.
# ---------------------------------------------------------------------------
def _gram(x):
    if x.dtype not in (jnp.float32, jnp.bfloat16):
        x = x.astype(jnp.float32)
    if x.shape[0] <= 4:
        return _gram_small_b(x)
    return _gram_dot(x)


def _loss_from_grams(g1, g2, d1, d2):
    eps = 1e-6
    n1 = jnp.sqrt(jnp.diag(g1))                         # row L2 norms of x1
    n2 = jnp.sqrt(jnp.diag(g2))
    s1 = (n1[:, None] + eps) * (n1[None, :] + eps)
    s2 = (n2[:, None] + eps) * (n2[None, :] + eps)
    return jnp.sum((g1 / s1) * (g2 / s2)) / (d1 * d2)


@jax.jit
def diff_loss(input1, input2):
    b = input1.shape[0]
    x1 = input1.reshape(b, -1)
    x2 = input2.reshape(b, -1)
    d1 = x1.shape[1]
    d2 = x2.shape[1]
    g1 = _gram(x1)
    g2 = _gram(x2)
    return _loss_from_grams(g1, g2, d1, d2)


def diff_loss_ref(input1, input2):
    b = input1.shape[0]
    x1 = input1.reshape(b, -1).astype(jnp.float32)
    x2 = input2.reshape(b, -1).astype(jnp.float32)
    n1 = jnp.linalg.norm(x1, axis=1, keepdims=True)
    n2 = jnp.linalg.norm(x2, axis=1, keepdims=True)
    x1n = x1 / (n1 + 1e-6)
    x2n = x2 / (n2 + 1e-6)
    m = jnp.einsum("bi,bj->ij", x1n, x2n, precision=lax.Precision.HIGHEST)
    return jnp.mean(m ** 2)


if __name__ == "__main__":
    key = jax.random.PRNGKey(0)
    k1, k2, k3, k4 = jax.random.split(key, 4)

    # Primary case (small-B VPU path): two (2, 4, 16, 16) f32 feature maps.
    a1 = jax.random.normal(k1, (2, 4, 16, 16), dtype=jnp.float32)
    a2 = jax.random.normal(k2, (2, 4, 16, 16), dtype=jnp.float32)
    loss = jax.block_until_ready(diff_loss(a1, a2))
    ref = jax.block_until_ready(diff_loss_ref(a1, a2))
    assert jnp.allclose(loss, ref, rtol=1e-4, atol=1e-8), (loss, ref)

    # Secondary case (general-B MXU path, bf16 fed directly to the kernel).
    b1 = jax.random.normal(k3, (8, 3, 8, 8), dtype=jnp.float32).astype(jnp.bfloat16)
    b2 = jax.random.normal(k4, (8, 3, 8, 8), dtype=jnp.float32).astype(jnp.bfloat16)
    loss2 = jax.block_until_ready(diff_loss(b1, b2))
    ref2 = jax.block_until_ready(
        diff_loss_ref(b1.astype(jnp.float32), b2.astype(jnp.float32)))
    assert jnp.allclose(loss2, ref2, rtol=1e-4, atol=1e-8), (loss2, ref2)

    print("KERNEL_OK")
</pallas_src>

<mosaic_0001>
module attributes {stable_mosaic.version = 11 : i64} {
  func.func @_gram_pairs_kernel(%arg0: i32, %arg1: i32, %arg2: memref<2x8x128xf32, #tpu.memory_space<vmem>>, %arg3: memref<1x3x8x128xf32, #tpu.memory_space<vmem>>) attributes {dimension_semantics = [#tpu.dimension_semantics<parallel>, #tpu.dimension_semantics<arbitrary>], iteration_bounds = array<i64: 1, 1>, scalar_prefetch = 0 : i64, scratch_operands = 0 : i64, tpu.core_type = #tpu.core_type<tc>, window_params = [{transform_indices = @transform_0, window_bounds = array<i64: 2, 8, 128>}, {transform_indices = @transform_1, window_bounds = array<i64: 1, 3, 8, 128>}]} {
    %c0_i32 = arith.constant 0 : i32
    %0 = arith.cmpi eq, %arg1, %c0_i32 : i32
    %1 = arith.extui %0 : i1 to i32
    %c0_i32_0 = arith.constant 0 : i32
    %2 = arith.cmpi ne, %1, %c0_i32_0 : i32
    scf.if %2 {
      %cst = arith.constant 0.000000e+00 : f32
      %28 = vector.broadcast %cst : f32 to vector<1x3x8x128xf32>
      %c0_28 = arith.constant 0 : index
      %c0_29 = arith.constant 0 : index
      %c0_30 = arith.constant 0 : index
      %c0_31 = arith.constant 0 : index
      %29 = vector.load %arg3[%c0_28, %c0_29, %c0_30, %c0_31] : memref<1x3x8x128xf32, #tpu.memory_space<vmem>>, vector<1x3x8x128xf32>
      tpu.vector_store %arg3[%c0_28, %c0_29, %c0_30, %c0_31], %28 {strides = array<i32>} : memref<1x3x8x128xf32, #tpu.memory_space<vmem>>, vector<1x3x8x128xf32>,
    } else {
    }
    %c0 = arith.constant 0 : index
    %c0_1 = arith.constant 0 : index
    %c0_2 = arith.constant 0 : index
    %3 = vector.load %arg2[%c0, %c0_1, %c0_2] : memref<2x8x128xf32, #tpu.memory_space<vmem>>, vector<1x8x128xf32>
    %4 = vector.shape_cast %3 : vector<1x8x128xf32> to vector<8x128xf32>
    %c1 = arith.constant 1 : index
    %c0_3 = arith.constant 0 : index
    %c0_4 = arith.constant 0 : index
    %5 = vector.load %arg2[%c1, %c0_3, %c0_4] : memref<2x8x128xf32, #tpu.memory_space<vmem>>, vector<1x8x128xf32>
    %6 = vector.shape_cast %5 : vector<1x8x128xf32> to vector<8x128xf32>
    %c0_5 = arith.constant 0 : index
    %c0_6 = arith.constant 0 : index
    %c0_7 = arith.constant 0 : index
    %c0_8 = arith.constant 0 : index
    %7 = vector.load %arg3[%c0_5, %c0_6, %c0_7, %c0_8] : memref<1x3x8x128xf32, #tpu.memory_space<vmem>>, vector<1x1x8x128xf32>
    %8 = vector.shape_cast %7 : vector<1x1x8x128xf32> to vector<8x128xf32>
    %9 = arith.mulf %4, %4 : vector<8x128xf32>
    %10 = arith.addf %8, %9 : vector<8x128xf32>
    %c0_9 = arith.constant 0 : index
    %c0_10 = arith.constant 0 : index
    %c0_11 = arith.constant 0 : index
    %c0_12 = arith.constant 0 : index
    %11 = vector.load %arg3[%c0_9, %c0_10, %c0_11, %c0_12] : memref<1x3x8x128xf32, #tpu.memory_space<vmem>>, vector<1x1x8x128xf32>
    %12 = vector.shape_cast %11 : vector<1x1x8x128xf32> to vector<8x128xf32>
    %13 = vector.shape_cast %10 : vector<8x128xf32> to vector<1x1x8x128xf32>
    tpu.vector_store %arg3[%c0_9, %c0_10, %c0_11, %c0_12], %13 {strides = array<i32>} : memref<1x3x8x128xf32, #tpu.memory_space<vmem>>, vector<1x1x8x128xf32>,
    %c0_13 = arith.constant 0 : index
    %c1_14 = arith.constant 1 : index
    %c0_15 = arith.constant 0 : index
    %c0_16 = arith.constant 0 : index
    %14 = vector.load %arg3[%c0_13, %c1_14, %c0_15, %c0_16] : memref<1x3x8x128xf32, #tpu.memory_space<vmem>>, vector<1x1x8x128xf32>
    %15 = vector.shape_cast %14 : vector<1x1x8x128xf32> to vector<8x128xf32>
    %16 = arith.mulf %4, %6 : vector<8x128xf32>
    %17 = arith.addf %15, %16 : vector<8x128xf32>
    %c0_17 = arith.constant 0 : index
    %c1_18 = arith.constant 1 : index
    %c0_19 = arith.constant 0 : index
    %c0_20 = arith.constant 0 : index
    %18 = vector.load %arg3[%c0_17, %c1_18, %c0_19, %c0_20] : memref<1x3x8x128xf32, #tpu.memory_space<vmem>>, vector<1x1x8x128xf32>
    %19 = vector.shape_cast %18 : vector<1x1x8x128xf32> to vector<8x128xf32>
    %20 = vector.shape_cast %17 : vector<8x128xf32> to vector<1x1x8x128xf32>
    tpu.vector_store %arg3[%c0_17, %c1_18, %c0_19, %c0_20], %20 {strides = array<i32>} : memref<1x3x8x128xf32, #tpu.memory_space<vmem>>, vector<1x1x8x128xf32>,
    %c0_21 = arith.constant 0 : index
    %c2 = arith.constant 2 : index
    %c0_22 = arith.constant 0 : index
    %c0_23 = arith.constant 0 : index
    %21 = vector.load %arg3[%c0_21, %c2, %c0_22, %c0_23] : memref<1x3x8x128xf32, #tpu.memory_space<vmem>>, vector<1x1x8x128xf32>
    %22 = vector.shape_cast %21 : vector<1x1x8x128xf32> to vector<8x128xf32>
    %23 = arith.mulf %6, %6 : vector<8x128xf32>
    %24 = arith.addf %22, %23 : vector<8x128xf32>
    %c0_24 = arith.constant 0 : index
    %c2_25 = arith.constant 2 : index
    %c0_26 = arith.constant 0 : index
    %c0_27 = arith.constant 0 : index
    %25 = vector.load %arg3[%c0_24, %c2_25, %c0_26, %c0_27] : memref<1x3x8x128xf32, #tpu.memory_space<vmem>>, vector<1x1x8x128xf32>
    %26 = vector.shape_cast %25 : vector<1x1x8x128xf32> to vector<8x128xf32>
    %27 = vector.shape_cast %24 : vector<8x128xf32> to vector<1x1x8x128xf32>
    tpu.vector_store %arg3[%c0_24, %c2_25, %c0_26, %c0_27], %27 {strides = array<i32>} : memref<1x3x8x128xf32, #tpu.memory_space<vmem>>, vector<1x1x8x128xf32>,
    return
  }
  func.func @transform_0(%arg0: i32, %arg1: i32) -> (i32, i32, i32) {
    %c1_i32 = arith.constant 1 : i32
    %0 = arith.muli %arg0, %c1_i32 : i32
    %1 = arith.addi %0, %arg1 : i32
    %c0_i32 = arith.constant 0 : i32
    %c0_i32_0 = arith.constant 0 : i32
    %c0_i32_1 = arith.constant 0 : i32
    return %c0_i32, %1, %c0_i32_0 : i32, i32, i32
  }
  func.func @transform_1(%arg0: i32, %arg1: i32) -> (i32, i32, i32, i32) {
    %c0_i32 = arith.constant 0 : i32
    %c0_i32_0 = arith.constant 0 : i32
    %c0_i32_1 = arith.constant 0 : i32
    %c0_i32_2 = arith.constant 0 : i32
    return %arg0, %c0_i32, %c0_i32_0, %c0_i32_1 : i32, i32, i32, i32
  }
}

</mosaic_0001>

<bundles_post_ra>
// kernel: diff_loss.2
= control target key start
LH: loop header
LB: loop body
LE: loop exit
PB: predicated region body
PF: predicated region fallthrough
CT: control target
= control target key end

     0   :  { %s90_s0 = inlined_call_operand.vmem [shape: f32[2,8,128], index: 0, kind: input, shape index: {}]   ;;  %s91_s1 = inlined_call_operand.vmem [shape: f32[1,3,8,128], index: 1, kind: output, shape index: {}]  }
   0x1   :  { %v32_v0 = vld [vmem:[%s90_s0] sm:$0xff]  ;;  %v59_v1 = vld [vmem:[%s90_s0 + $0x8] sm:$0xff] }
   0x2   :  { %v36_v2 = vmul.f32 %v32_v0, %v32_v0  ;;  %v41_v3 = vmul.f32 %v59_v1, %v32_v0  ;;  %v46_v4 = vmul.f32 %v59_v1, %v59_v1 }
   0x4   :  { %38 = vst [vmem:[%s91_s1] sm:$0xff] %v36_v2  ;;  %61 = vst [vmem:[%s91_s1 + $0x8] sm:$0xff] %v41_v3 }
   0x5   :  { %63 = vst [vmem:[%s91_s1 + $0x10] sm:$0xff] %v46_v4 }

</bundles_post_ra>
